<compile_context>
chip_gen: v5e
topology: v5e:2x2
jax: 0.10.0
libtpu: 0.0.40
codegen_flags: <defaults>
</compile_context>

<pallas_src>
import jax
import jax.numpy as jnp
from jax import lax
from jax.experimental import pallas as pl
from jax.experimental.pallas import tpu as pltpu


def _uniranknet_kernel(xt_ref, w1t_ref, b1_ref, w2t_ref, b2_ref, o_ref):
    # xt_ref : (D_in, TB)  input block, batch on lanes
    # w1t_ref: (H, D_in)   layer-1 weight (transposed), VMEM-resident
    # b1_ref : (H, 1)      layer-1 bias (broadcasts over lanes)
    # w2t_ref: (1, H)      layer-2 weight (transposed), f32
    # b2_ref : (1, 1)      layer-2 bias, f32
    # o_ref  : (1, TB)     lane-dense output block
    # Linear 1: (H, D_in) @ (D_in, TB) -> (H, TB); f32 MXU accumulation.
    h = jnp.dot(w1t_ref[...], xt_ref[...],
                preferred_element_type=jnp.float32,
                precision=lax.Precision.HIGHEST)
    h = jnp.maximum(h + b1_ref[...], 0.0)          # bias + ReLU on VPU
    # Linear 2: (1, H) @ (H, TB) -> (1, TB); lane-dense output.
    y = jnp.dot(w2t_ref[...], h,
                preferred_element_type=jnp.float32,
                precision=lax.Precision.HIGHEST)
    o_ref[...] = (y + b2_ref[...]).astype(o_ref.dtype)


def _choose_tiling(B, tb_target, d_in, x_itemsize):
    """Pick a lane-dense batch tile / grid. Returns (tb, grid_n, vmem_limit|None)."""
    if B <= 128:
        # Single tiny block; block_shape == full array dims (no lane padding games).
        return B, 1, None

    n128 = pl.cdiv(B, 128)                          # 128-wide lane tiles in the batch
    # Clamp so double-buffered blocks stay well under ~40 MiB (safe even on v7x).
    bytes_per_tile = 2 * d_in * 128 * x_itemsize + 2 * 128 * 4
    max_tiles_vmem = max(1, (40 << 20) // bytes_per_tile)
    tiles = max(1, min(tb_target // 128, n128, max_tiles_vmem))
    steps = pl.cdiv(n128, tiles)

    # Prefer an even grid >= 2: with ("parallel",) this feeds both v7x
    # TensorCores.  Best effort only for very ragged shapes.
    if steps % 2 == 1:
        for _ in range(4):
            steps += 1
            tiles = pl.cdiv(n128, steps)
            steps = pl.cdiv(n128, tiles)
            if steps % 2 == 0:
                break

    tb = tiles * 128
    grid_n = pl.cdiv(B, tb)

    # Double-buffered x block + double-buffered f32 out block + resident weights.
    vmem_bytes = 2 * d_in * tb * x_itemsize + 2 * tb * 4 + (256 << 10)
    vmem_limit = None
    if vmem_bytes > (14 << 20):                     # above v5e's 16 MiB scoped default
        vmem_limit = min(vmem_bytes * 5 // 4, 48 << 20)
    return tb, grid_n, vmem_limit


def uniranknet_forward_batch_last(xt, w1, b1, w2, b2, *, tb=131072):
    """Recommended entry point.  xt: (D_in, B) = x transposed (batch-last).

    Returns (1, B) float32 scores.  No wrapper-side transpose/pad/cast: the
    kernel's own DMA is the only HBM pass over x."""
    D_in, B = xt.shape
    H = w1.shape[1]
    tb, grid_n, vmem_limit = _choose_tiling(B, tb, D_in, xt.dtype.itemsize)

    # Tiny weight/bias operands (a few KiB) — reshaped once, VMEM-resident
    # across the whole grid via constant index_maps.
    w1t = w1.T.astype(xt.dtype)                     # (H, D_in); matches x dtype
    b1c = b1.reshape(H, 1).astype(jnp.float32)
    w2t = w2.reshape(1, H).astype(jnp.float32)
    b2c = b2.reshape(1, 1).astype(jnp.float32)

    return pl.pallas_call(
        _uniranknet_kernel,
        out_shape=jax.ShapeDtypeStruct((1, B), jnp.float32),
        grid=(grid_n,),
        in_specs=[
            pl.BlockSpec((D_in, tb), lambda i: (0, i)),   # x^T: tiled over batch
            pl.BlockSpec((H, D_in), lambda i: (0, 0)),    # W1^T: resident
            pl.BlockSpec((H, 1), lambda i: (0, 0)),       # b1:   resident
            pl.BlockSpec((1, H), lambda i: (0, 0)),       # W2^T: resident
            pl.BlockSpec((1, 1), lambda i: (0, 0)),       # b2:   resident
        ],
        out_specs=pl.BlockSpec((1, tb), lambda i: (0, i)),
        compiler_params=pltpu.CompilerParams(
            dimension_semantics=("parallel",),            # shards across v7x TCs
            vmem_limit_bytes=vmem_limit,
        ),
    )(xt, w1t, b1c, w2t, b2c)


def uniranknet_forward(x, w1, b1, w2, b2, *, tb=131072):
    """PyTorch-layout entry: x (B, D_in) -> (B, 1).

    The single transpose here is the one remaining layout copy over x; for
    the HBM roofline at large B, produce x batch-last upstream and call
    uniranknet_forward_batch_last directly."""
    B = x.shape[0]
    yt = uniranknet_forward_batch_last(jnp.transpose(x), w1, b1, w2, b2, tb=tb)
    return yt.reshape(B, 1)


def init_params(key, input_dim=8, hidden=32):
    """Deterministic init mimicking PyTorch nn.Linear default U[-1/sqrt(fan_in), +]."""
    k1, k2, k3, k4 = jax.random.split(key, 4)
    bound1 = 1.0 / jnp.sqrt(jnp.float32(input_dim))
    bound2 = 1.0 / jnp.sqrt(jnp.float32(hidden))
    # Stored as (in, out) so reference math is x @ W.
    w1 = jax.random.uniform(k1, (input_dim, hidden), jnp.float32, -bound1, bound1)
    b1 = jax.random.uniform(k2, (hidden,), jnp.float32, -bound1, bound1)
    w2 = jax.random.uniform(k3, (hidden, 1), jnp.float32, -bound2, bound2)
    b2 = jax.random.uniform(k4, (1,), jnp.float32, -bound2, bound2)
    return w1, b1, w2, b2


def _reference(x, w1, b1, w2, b2):
    h = jnp.maximum(jnp.dot(x, w1, precision=lax.Precision.HIGHEST) + b1, 0.0)
    return jnp.dot(h, w2, precision=lax.Precision.HIGHEST) + b2


if __name__ == "__main__":
    key = jax.random.PRNGKey(0)
    k_x1, k_x2, k_p = jax.random.split(key, 3)

    input_dim, hidden = 8, 32
    w1, b1, w2, b2 = init_params(k_p, input_dim, hidden)

    # 1) Small batch via the PyTorch-layout wrapper: single block whose
    #    block_shape equals the full array dims.
    batch = 8
    x = jax.random.normal(k_x1, (batch, input_dim), jnp.float32)
    out = jax.block_until_ready(uniranknet_forward(x, w1, b1, w2, b2))
    ref = _reference(x, w1, b1, w2, b2)
    assert out.shape == (batch, 1)
    assert jnp.allclose(out, ref, atol=2e-5, rtol=2e-5), \
        float(jnp.max(jnp.abs(out - ref)))

    # 2) Ragged batch with a small tile via the recommended batch-last entry:
    #    multi-step even grid + masked ragged final block, no pad copy.
    batch2 = 300
    x2 = jax.random.normal(k_x2, (batch2, input_dim), jnp.float32)
    xt2 = x2.T   # "producer" emits batch-last; wrapper does zero copies
    out2 = jax.block_until_ready(
        uniranknet_forward_batch_last(xt2, w1, b1, w2, b2, tb=256))
    ref2 = _reference(x2, w1, b1, w2, b2)
    assert out2.shape == (1, batch2)
    assert jnp.allclose(out2.reshape(batch2, 1), ref2, atol=2e-5, rtol=2e-5), \
        float(jnp.max(jnp.abs(out2.reshape(batch2, 1) - ref2)))

    print("KERNEL_OK")
</pallas_src>

<mosaic_0001>
module attributes {stable_mosaic.version = 11 : i64} {
  func.func @_uniranknet_kernel(%arg0: i32, %arg1: memref<8x8xf32, #tpu.memory_space<vmem>>, %arg2: memref<32x8xf32, #tpu.memory_space<vmem>>, %arg3: memref<32x1xf32, #tpu.memory_space<vmem>>, %arg4: memref<1x32xf32, #tpu.memory_space<vmem>>, %arg5: memref<1x1xf32, #tpu.memory_space<vmem>>, %arg6: memref<1x8xf32, #tpu.memory_space<vmem>>) attributes {dimension_semantics = [#tpu.dimension_semantics<parallel>], iteration_bounds = array<i64: 1>, scalar_prefetch = 0 : i64, scratch_operands = 0 : i64, tpu.core_type = #tpu.core_type<tc>, window_params = [{transform_indices = @transform_0, window_bounds = array<i64: 8, 8>}, {pipeline_mode = #tpu.pipeline_mode<synchronous>, transform_indices = @transform_1, window_bounds = array<i64: 32, 8>}, {pipeline_mode = #tpu.pipeline_mode<synchronous>, transform_indices = @transform_2, window_bounds = array<i64: 32, 1>}, {pipeline_mode = #tpu.pipeline_mode<synchronous>, transform_indices = @transform_3, window_bounds = array<i64: 1, 32>}, {pipeline_mode = #tpu.pipeline_mode<synchronous>, transform_indices = @transform_4, window_bounds = array<i64: 1, 1>}, {transform_indices = @transform_5, window_bounds = array<i64: 1, 8>}]} {
    %c0 = arith.constant 0 : index
    %c0_0 = arith.constant 0 : index
    %0 = vector.load %arg2[%c0, %c0_0] : memref<32x8xf32, #tpu.memory_space<vmem>>, vector<32x8xf32>
    %c0_1 = arith.constant 0 : index
    %c0_2 = arith.constant 0 : index
    %1 = vector.load %arg1[%c0_1, %c0_2] : memref<8x8xf32, #tpu.memory_space<vmem>>, vector<8x8xf32>
    %cst = arith.constant dense<0.000000e+00> : vector<32x8xf32>
    %2 = tpu.matmul %0, %1, %cst {dimension_numbers = #tpu.dot_dimension_numbers<[1], [0], [0], [1], [0, 0, 1, 1], [], []>, precision = #tpu.contract_precision<fp32>} : vector<32x8xf32>, vector<8x8xf32>, vector<32x8xf32> -> vector<32x8xf32>
    %c0_3 = arith.constant 0 : index
    %c0_4 = arith.constant 0 : index
    %3 = vector.load %arg3[%c0_3, %c0_4] : memref<32x1xf32, #tpu.memory_space<vmem>>, vector<32x1xf32>
    %4 = vector.broadcast %3 : vector<32x1xf32> to vector<32x8xf32>
    %5 = arith.addf %2, %4 : vector<32x8xf32>
    %cst_5 = arith.constant 0.000000e+00 : f32
    %6 = vector.broadcast %cst_5 : f32 to vector<32x8xf32>
    %7 = arith.maximumf %5, %6 : vector<32x8xf32>
    %c0_6 = arith.constant 0 : index
    %c0_7 = arith.constant 0 : index
    %8 = vector.load %arg4[%c0_6, %c0_7] : memref<1x32xf32, #tpu.memory_space<vmem>>, vector<1x32xf32>
    %cst_8 = arith.constant dense<0.000000e+00> : vector<1x8xf32>
    %9 = tpu.matmul %8, %7, %cst_8 {dimension_numbers = #tpu.dot_dimension_numbers<[1], [0], [0], [1], [0, 0, 1, 1], [], []>, precision = #tpu.contract_precision<fp32>} : vector<1x32xf32>, vector<32x8xf32>, vector<1x8xf32> -> vector<1x8xf32>
    %c0_9 = arith.constant 0 : index
    %c0_10 = arith.constant 0 : index
    %10 = vector.load %arg5[%c0_9, %c0_10] : memref<1x1xf32, #tpu.memory_space<vmem>>, vector<1x1xf32>
    %11 = vector.broadcast %10 : vector<1x1xf32> to vector<1x8xf32>
    %12 = arith.addf %9, %11 : vector<1x8xf32>
    %c0_11 = arith.constant 0 : index
    %c0_12 = arith.constant 0 : index
    %13 = vector.load %arg6[%c0_11, %c0_12] : memref<1x8xf32, #tpu.memory_space<vmem>>, vector<1x8xf32>
    tpu.vector_store %arg6[%c0_11, %c0_12], %12 {strides = array<i32>} : memref<1x8xf32, #tpu.memory_space<vmem>>, vector<1x8xf32>,
    return
  }
  func.func @transform_0(%arg0: i32) -> (i32, i32) {
    %c0_i32 = arith.constant 0 : i32
    %c0_i32_0 = arith.constant 0 : i32
    return %c0_i32, %arg0 : i32, i32
  }
  func.func @transform_1(%arg0: i32) -> (i32, i32) {
    %c0_i32 = arith.constant 0 : i32
    %c0_i32_0 = arith.constant 0 : i32
    %c0_i32_1 = arith.constant 0 : i32
    return %c0_i32, %c0_i32_0 : i32, i32
  }
  func.func @transform_2(%arg0: i32) -> (i32, i32) {
    %c0_i32 = arith.constant 0 : i32
    %c0_i32_0 = arith.constant 0 : i32
    %c0_i32_1 = arith.constant 0 : i32
    return %c0_i32, %c0_i32_0 : i32, i32
  }
  func.func @transform_3(%arg0: i32) -> (i32, i32) {
    %c0_i32 = arith.constant 0 : i32
    %c0_i32_0 = arith.constant 0 : i32
    %c0_i32_1 = arith.constant 0 : i32
    return %c0_i32, %c0_i32_0 : i32, i32
  }
  func.func @transform_4(%arg0: i32) -> (i32, i32) {
    %c0_i32 = arith.constant 0 : i32
    %c0_i32_0 = arith.constant 0 : i32
    %c0_i32_1 = arith.constant 0 : i32
    return %c0_i32, %c0_i32_0 : i32, i32
  }
  func.func @transform_5(%arg0: i32) -> (i32, i32) {
    %c0_i32 = arith.constant 0 : i32
    %c0_i32_0 = arith.constant 0 : i32
    return %c0_i32, %arg0 : i32, i32
  }
}

</mosaic_0001>

<bundles_post_ra>
// kernel: tpu_custom_call.1
= control target key start
LH: loop header
LB: loop body
LE: loop exit
PB: predicated region body
PF: predicated region fallthrough
CT: control target
= control target key end

     0   :  { %s632_s0 = inlined_call_operand.vmem [shape: f32[8,8], index: 0, kind: input, shape index: {}]   ;;  %s633_s1 = inlined_call_operand.vmem [shape: f32[32,8], index: 1, kind: input, shape index: {}]   ;;  %s634_s2 = inlined_call_operand.vmem [shape: f32[32,1], index: 2, kind: input, shape index: {}]   ;;  %s635_s3 = inlined_call_operand.vmem [shape: f32[1,32], index: 3, kind: input, shape index: {}]   ;;  %s636_s4 = inlined_call_operand.<no memory space> [shape: f32[1,1], index: 4, kind: input, shape index: {}]   ;;  %s637_s5 = inlined_call_operand.hbm [shape: f32[1,8], index: 5, kind: output, shape index: {}]  }
   0x1   :  { %v10_v0 = vstv %s636_s4 }
   0x2   :  { %11 = vst [vmem:[#allocation2] sm:$0x1] %v10_v0 }
   0x3   :  { %v27_v1 = vld [vmem:[%s632_s0] sm:$0xff]  ;;  %vm52_vm0 = vcmask 64512   ;;  %v29_v3 = vld [vmem:[%s634_s2 + $0x8] sm:$0xff]  ;;  %v554_v6 = vmov 0   ;;  %v25_v10 = vld [vmem:[%s633_s1 + $0x10] sm:$0xff] }
   0x4   :  { %v23_v2 = vld [vmem:[%s633_s1] sm:$0xff]  ;;  %v80_v4 = vand.u32 4294901760, %v27_v1  ;;  %526 = vset.pattern.permute.xlu1 %v554_v6  ;;  %v24_v7 = vld [vmem:[%s633_s1 + $0x8] sm:$0xff]  ;;  %525 = vset.pattern.permute.xlu0 %v554_v6  ;;  %v31_v11 = vld [vmem:[%s634_s2 + $0x18] sm:$0xff] }
   0x5   :  { %v54_v5 = vsel %vm52_vm0, %v23_v2, 0  ;;  %39 = vperm.xlu1 %526, %v29_v3   ;;  %v57_v9 = vsel %vm52_vm0, %v24_v7, 0  ;;  %527 = vset.pattern.permute.xlu2 %v554_v6 }
   0x6   :  { %v82_v8 = vand.u32 4294901760, %v54_v5  ;;  %v131_v12 = vsub.f32 %v27_v1, %v80_v4  ;;  %81 = vmatpush.msra.mxu0 %v80_v4  ;;  %208 = vmatpush.msra.mxu3 %v80_v4  ;;  %v90_v13 = vand.u32 4294901760, %v57_v9 }
   0x7   :  { %12 = vsyncpa [#allocation4], 0  ;;  %49 = vperm.xlu0 %525, %v31_v11   ;;  %v60_v17 = vsel %vm52_vm0, %v25_v10, 0  ;;  %v28_v20 = vld [vmem:[%s634_s2] sm:$0xff]  ;;  %v26_v26 = vld [vmem:[%s633_s1 + $0x18] sm:$0xff]  ;;  %vm316_vm1 = vcmask 261120  }
   0x8   :  { %v83_v14 = vsub.f32 %v54_v5, %v82_v8  ;;  %170 = vmatpush.msra.mxu2 %v131_v12  ;;  %v132_v15 = vand.u32 4294901760, %v131_v12  ;;  %v91_v16 = vsub.f32 %v57_v9, %v90_v13  ;;  %v98_v23 = vand.u32 4294901760, %v60_v17  ;;  %v30_v27 = vld [vmem:[%s634_s2 + $0x10] sm:$0xff]  ;;  %s514_s14 = sshll.u32 %s637_s5, 4  ;;  %s515_s14 = int_to_ptr.hbm [resolvable:$true] %s514_s14 }
   0x9   :  { %v63_v30 = vsel %vm52_vm0, %v26_v26, 0  ;;  %vm505_vm2 = vcmask 57344  }
   0xa   :  { %173 = vmatmul.f32.vlgmr.msra.gmra.mxu2 %v83_v14  ;;  %v84_v18 = vand.u32 4294901760, %v83_v14  ;;  %v133_v19 = vsub.f32 %v131_v12, %v132_v15  ;;  %252 = vmatpush.msrb.mxu0 %v132_v15  ;;  %v92_v22 = vand.u32 4294901760, %v91_v16  ;;  %v99_v29 = vsub.f32 %v60_v17, %v98_v23 }
   0xb   :  { %v106_v33 = vand.u32 4294901760, %v63_v30 }
   0xc   :  { %v85_v21 = vsub.f32 %v83_v14, %v84_v18  ;;  %212 = vmatmul.f32.vlgmr.msra.gmra.mxu3 %v84_v18  ;;  %v134_v24 = vand.u32 4294901760, %v133_v19  ;;  %v93_v28 = vsub.f32 %v91_v16, %v92_v22  ;;  %v100_v32 = vand.u32 4294901760, %v99_v29  ;;  %v308_v14 = vld [vmem:[%s635_s3] sm:$0x1]  ;;  %s555_s3 = smov [#allocation3]  }
   0xd   :  { %34 = vperm.xlu1 %526, %v28_v20   ;;  %v107_v35 = vsub.f32 %v63_v30, %v106_v33  ;;  %v318_v19 = vsel %vm316_vm1, %v308_v14, 0  ;;  %s512_s11 = sshll.u32 %s555_s3, 4  ;;  %s513_s11 = int_to_ptr.vmem [resolvable:$true] %s512_s11 }
   0xe   :  { %v86_v25 = vand.u32 4294901760, %v85_v21  ;;  %135 = vmatpush.msra.mxu1 %v134_v24  ;;  %v94_v31 = vand.u32 4294901760, %v93_v28  ;;  %v101_v34 = vsub.f32 %v99_v29, %v100_v32  ;;  %v623_v26 = vand.u32 4294901760, %v318_v19 }
   0xf   :  { %137 = vmatmul.f32.vlgmr.msra.gmra.mxu1 %v82_v8  ;;  %44 = vperm.xlu0 %525, %v30_v27   ;;  %v108_v37 = vand.u32 4294901760, %v107_v35 }
  0x10   :  { %87 = vmatmul.f32.vlgmr.msra.gmra.mxu0 %v86_v25  ;;  %286 = vmatpush.msrb.mxu1 %v80_v4  ;;  %v102_v36 = vand.u32 4294901760, %v101_v34  ;;  %v341_v34 = vsub.f32 %v318_v19, %v623_v26 }
  0x11   :  { %v109_v38 = vsub.f32 %v107_v35, %v108_v37 }
  0x12   :  { %178 = vmatmul.f32.gmra.mxu2 %v91_v16 }
  0x13   :  { %v110_v39 = vand.u32 4294901760, %v109_v38 }
  0x14   :  { %218 = vmatmul.f32.gmra.mxu3 %v92_v22 }
  0x17   :  { %141 = vmatmul.f32.gmra.mxu1 %v90_v13 }
  0x18   :  { %95 = vmatmul.f32.gmra.mxu0 %v94_v31 }
  0x1a   :  { %183 = vmatmul.f32.gmra.mxu2 %v99_v29 }
  0x1c   :  { %224 = vmatmul.f32.gmra.mxu3 %v100_v32 }
  0x1f   :  { %145 = vmatmul.f32.gmra.mxu1 %v98_v23 }
  0x20   :  { %103 = vmatmul.f32.gmra.mxu0 %v102_v36 }
  0x22   :  { %188 = vmatmul.f32.gmra.mxu2 %v107_v35 }
  0x24   :  { %230 = vmatmul.f32.gmra.mxu3 %v108_v37 }
  0x27   :  { %149 = vmatmul.f32.gmra.mxu1 %v106_v33 }
  0x28   :  { %111 = vmatmul.f32.gmra.mxu0 %v110_v39 }
  0x2f   :  { %288 = vmatmul.f32.vlgmr.msrb.gmra.mxu1 %v82_v8 }
  0x30   :  { %254 = vmatmul.f32.vlgmr.msrb.gmra.mxu0 %v82_v8 }
  0x37   :  { %292 = vmatmul.f32.gmra.mxu1 %v90_v13 }
  0x38   :  { %258 = vmatmul.f32.gmra.mxu0 %v90_v13 }
  0x3f   :  { %296 = vmatmul.f32.gmra.mxu1 %v98_v23 }
  0x40   :  { %262 = vmatmul.f32.gmra.mxu0 %v98_v23 }
  0x47   :  { %300 = vmatmul.f32.gmra.mxu1 %v106_v33 }
  0x48   :  { %266 = vmatmul.f32.gmra.mxu0 %v106_v33 }
  0x77   :  { %v40_v47 = vpop.permute.xlu1 %39 }
  0x79   :  { %v50_v49 = vpop.permute.xlu0 %49 }
  0x7f   :  { %v35_v53 = vpop.permute.xlu1 %34 }
  0x81   :  { %v45_v55 = vpop.permute.xlu0 %44 }
  0x8c   :  { %v138_v41 = vpop.f32.mrf.mxu1 }
  0x8d   :  { %v88_v40 = vpop.f32.mrf.mxu0  ;;  %v174_v46 = vpop.f32.mrf.mxu2 }
  0x8e   :  { %v89_v59 = vadd.f32 %v88_v40, %v35_v53  ;;  %v342_v40 = vand.u32 4294901760, %v341_v34 }
  0x8f   :  { %v213_v48 = vpop.f32.mrf.mxu3 }
  0x90   :  { %v139_v63 = vadd.f32 %v138_v41, %v89_v59 }
  0x92   :  { %v175_v4 = vadd.f32 %v174_v46, %v139_v63  ;;  %v343_v46 = vsub.f32 %v341_v34, %v342_v40 }
  0x94   :  { %v142_v43 = vpop.f32.mrf.mxu1  ;;  %v214_v9 = vadd.f32 %v213_v48, %v175_v4 }
  0x95   :  { %v96_v42 = vpop.f32.mrf.mxu0  ;;  %v179_v52 = vpop.f32.mrf.mxu2 }
  0x96   :  { %v97_v58 = vadd.f32 %v96_v42, %v40_v47  ;;  %v309_v47 = vld [vmem:[#allocation2] sm:$0x1] }
  0x97   :  { %v219_v54 = vpop.f32.mrf.mxu3  ;;  %312 = vperm.xlu2 %527, %v309_v47  }
  0x98   :  { %v143_v61 = vadd.f32 %v142_v43, %v97_v58 }
  0x9a   :  { %v180_v3 = vadd.f32 %v179_v52, %v143_v61  ;;  %v344_v52 = vand.u32 4294901760, %v343_v46 }
  0x9c   :  { %v146_v45 = vpop.f32.mrf.mxu1  ;;  %v220_v8 = vadd.f32 %v219_v54, %v180_v3 }
  0x9d   :  { %v104_v44 = vpop.f32.mrf.mxu0  ;;  %v184_v62 = vpop.f32.mrf.mxu2 }
  0x9e   :  { %v105_v60 = vadd.f32 %v104_v44, %v45_v55 }
  0x9f   :  { %v225_v5 = vpop.f32.mrf.mxu3 }
  0xa0   :  { %v147_v0 = vadd.f32 %v146_v45, %v105_v60 }
  0xa2   :  { %v185_v6 = vadd.f32 %v184_v62, %v147_v0 }
  0xa4   :  { %v150_v51 = vpop.f32.mrf.mxu1  ;;  %v226_v10 = vadd.f32 %v225_v5, %v185_v6 }
  0xa5   :  { %v112_v50 = vpop.f32.mrf.mxu0  ;;  %v189_v12 = vpop.f32.mrf.mxu2 }
  0xa6   :  { %v113_v7 = vadd.f32 %v112_v50, %v50_v49 }
  0xa7   :  { %v231_v23 = vpop.f32.mrf.mxu3 }
  0xa8   :  { %v151_v11 = vadd.f32 %v150_v51, %v113_v7 }
  0xaa   :  { %v190_v20 = vadd.f32 %v189_v12, %v151_v11 }
  0xac   :  { %v289_v57 = vpop.f32.mrf.mxu1  ;;  %v232_v27 = vadd.f32 %v231_v23, %v190_v20 }
  0xad   :  { %v255_v56 = vpop.f32.mrf.mxu0 }
  0xae   :  { %v256_v17 = vadd.f32 %v255_v56, %v214_v9 }
  0xb0   :  { %v290_v24 = vadd.f32 %v289_v57, %v256_v17 }
  0xb2   :  { %v304_v31 = vmax.f32 %v290_v24, 0.0 }
  0xb4   :  { %v293_v2 = vpop.f32.mrf.mxu1  ;;  %v338_v37 = vand.u32 4294901760, %v304_v31 }
  0xb5   :  { %v259_v1 = vpop.f32.mrf.mxu0 }
  0xb6   :  { %v260_v13 = vadd.f32 %v259_v1, %v220_v8  ;;  %v380_v43 = vsub.f32 %v304_v31, %v338_v37 }
  0xb8   :  { %v294_v21 = vadd.f32 %v293_v2, %v260_v13  ;;  %v381_v53 = vand.u32 4294901760, %v380_v43 }
  0xba   :  { %v305_v28 = vmax.f32 %v294_v21, 0.0  ;;  %v382_v57 = vsub.f32 %v380_v43, %v381_v53 }
  0xbc   :  { %v297_v16 = vpop.f32.mrf.mxu1  ;;  %v336_v35 = vand.u32 4294901760, %v305_v28  ;;  %v383_v59 = vand.u32 4294901760, %v382_v57 }
  0xbd   :  { %v263_v15 = vpop.f32.mrf.mxu0 }
  0xbe   :  { %v264_v18 = vadd.f32 %v263_v15, %v226_v10  ;;  %v374_v41 = vsub.f32 %v305_v28, %v336_v35 }
  0xc0   :  { %v298_v22 = vadd.f32 %v297_v16, %v264_v18  ;;  %v375_v49 = vand.u32 4294901760, %v374_v41 }
  0xc2   :  { %v306_v25 = vmax.f32 %v298_v22, 0.0  ;;  %v376_v55 = vsub.f32 %v374_v41, %v375_v49 }
  0xc4   :  { %v301_v30 = vpop.f32.mrf.mxu1  ;;  %v334_v32 = vand.u32 4294901760, %v306_v25  ;;  %v377_v58 = vand.u32 4294901760, %v376_v55 }
  0xc5   :  { %v267_v29 = vpop.f32.mrf.mxu0 }
  0xc6   :  { %v268_v33 = vadd.f32 %v267_v29, %v232_v27  ;;  %v368_v38 = vsub.f32 %v306_v25, %v334_v32 }
  0xc8   :  { %v302_v36 = vadd.f32 %v301_v30, %v268_v33  ;;  %v369_v45 = vand.u32 4294901760, %v368_v38 }
  0xca   :  { %v307_v39 = vmax.f32 %v302_v36, 0.0  ;;  %v370_v51 = vsub.f32 %v368_v38, %v369_v45 }
  0xcc   :  { %v332_v42 = vand.u32 4294901760, %v307_v39  ;;  %v371_v56 = vand.u32 4294901760, %v370_v51 }
  0xce   :  { %v362_v44 = vsub.f32 %v307_v39, %v332_v42  ;;  %333 = vmatpush.msrb.mxu2 %v332_v42 }
  0xd0   :  { %335 = vmatpush.msrb.mxu2 %v334_v32  ;;  %v363_v48 = vand.u32 4294901760, %v362_v44 }
  0xd2   :  { %337 = vmatpush.msrb.mxu2 %v336_v35  ;;  %v364_v50 = vsub.f32 %v362_v44, %v363_v48 }
  0xd4   :  { %339 = vmatpush.msrb.mxu2 %v338_v37  ;;  %v365_v54 = vand.u32 4294901760, %v364_v50 }
  0xd5   :  { %345 = vmatmul.f32.vlgmr.msrb.gmra.mxu2 %v344_v52 }
  0xd6   :  { %404 = vmatpush.msra.mxu2 %v362_v44  ;;  %366 = vmatpush.msrb.mxu3 %v365_v54 }
  0xd8   :  { %407 = vmatpush.msra.mxu2 %v368_v38  ;;  %372 = vmatpush.msrb.mxu3 %v371_v56 }
  0xda   :  { %410 = vmatpush.msra.mxu2 %v374_v41  ;;  %378 = vmatpush.msrb.mxu3 %v377_v58 }
  0xdc   :  { %413 = vmatpush.msra.mxu2 %v380_v43  ;;  %384 = vmatpush.msrb.mxu3 %v383_v59 }
  0xdd   :  { %386 = vmatmul.f32.vlgmr.msrb.gmra.mxu3 %v623_v26  ;;  %416 = vmatmul.f32.vlgmr.msra.gmra.mxu2 %v341_v34 }
  0xde   :  { %462 = vmatpush.msrb.mxu2 %v363_v48  ;;  %433 = vmatpush.msra.mxu3 %v332_v42 }
  0xe0   :  { %466 = vmatpush.msrb.mxu2 %v369_v45  ;;  %435 = vmatpush.msra.mxu3 %v334_v32 }
  0xe2   :  { %470 = vmatpush.msrb.mxu2 %v375_v49  ;;  %437 = vmatpush.msra.mxu3 %v336_v35 }
  0xe4   :  { %474 = vmatpush.msrb.mxu2 %v381_v53  ;;  %439 = vmatpush.msra.mxu3 %v338_v37 }
  0xe5   :  { %443 = vmatmul.f32.vlgmr.msra.gmra.mxu3 %v342_v40  ;;  %476 = vmatmul.f32.vlgmr.msrb.gmra.mxu2 %v623_v26 }
  0xe6   :  { %493 = vmatpush.msrb.mxu3 %v332_v42 }
  0xe8   :  { %495 = vmatpush.msrb.mxu3 %v334_v32 }
  0xea   :  { %497 = vmatpush.msrb.mxu3 %v336_v35 }
  0xec   :  { %499 = vmatpush.msrb.mxu3 %v338_v37 }
  0xed   :  { %501 = vmatmul.f32.vlgmr.msrb.gmra.mxu3 %v623_v26 }
  0xf1   :  { %v313_v61 = vpop.permute.xlu2 %312 }
  0xf2   :  { %v315_v62 = vperm.slane %v313_v61, 0 }
 0x158   :  { %v346_v60 = vpop.f32.mrf.mxu2 }
 0x159   :  { %v347_v0 = vadd.f32 %v346_v60, %v315_v62 }
 0x160   :  { %v387_v63 = vpop.f32.mrf.mxu3  ;;  %v417_v1 = vpop.f32.mrf.mxu2 }
 0x161   :  { %v388_v2 = vadd.f32 %v387_v63, %v347_v0 }
 0x163   :  { %v418_v4 = vadd.f32 %v417_v1, %v388_v2 }
 0x168   :  { %v444_v3 = vpop.f32.mrf.mxu3  ;;  %v477_v6 = vpop.f32.mrf.mxu2 }
 0x169   :  { %v445_v5 = vadd.f32 %v444_v3, %v418_v4 }
 0x16b   :  { %v478_v7 = vadd.f32 %v477_v6, %v445_v5 }
 0x170   :  { %v502_v8 = vpop.f32.mrf.mxu3 }
 0x171   :  { %v503_v9 = vadd.f32 %v502_v8, %v478_v7 }
 0x173   :  { %506 = vst.msk [vmem:[#allocation3] sm:$0x1] %vm505_vm2, %v503_v9 }
 0x174   :  { %517 = dma.vmem_to_hbm [thread:$0]  %s513_s11, 16, %s515_s14, [#allocation4]  }
 0x175   :  { %552 = dma.done.wait [#allocation4], 16  }
 0x176   :  { %553 = vsyncadd [#allocation4], 4294967280 }
 0x177   :  { %522 = vsyncpa [#allocation4], 1 }

</bundles_post_ra>
